<compile_context>
chip_gen: v5e
topology: v5e:2x2
jax: 0.10.0
libtpu: 0.0.40
codegen_flags: <defaults>
</compile_context>

<pallas_src>
import jax
import jax.numpy as jnp
from jax import lax
from jax.experimental import pallas as pl
from jax.experimental.pallas import tpu as pltpu


# ---------------------------------------------------------------- kernel ----

def _bilstm_kernel(xp_ref, h0_ref, wi_ref, wh_ref, bi_ref, wo_ref, bo_ref,
                   out_ref):
    B, twoH = h0_ref.shape
    H = twoH // 2
    SB = xp_ref.shape[0]
    S = SB // B
    G = 8 * H                                   # fused gate width (both dirs)

    # ---- hoisted, fused input projection (time-parallel, off the chain) ----
    # x_pair already carries [x_fwd | x_bwd(time+batch reversed)] in its lanes;
    # wi_fused is block-diagonal, so one matmul produces both directions' gate
    # pre-activations for every timestep.
    xw = (jnp.dot(xp_ref[...], wi_ref[...], preferred_element_type=jnp.float32)
          + bi_ref[...])                        # (S*B, 8H)

    wh = wh_ref[...]                            # (2H, 8H) block-diagonal

    # Single-transcendental activation constants:
    #   sigmoid(x) = 0.5*tanh(0.5*x) + 0.5  (exact identity)
    # cell-gate lanes [4H, 6H) keep plain tanh (scale=1, beta=0).
    lane = lax.broadcasted_iota(jnp.int32, (B, G), 1)
    is_cell = (lane >= 4 * H) & (lane < 6 * H)
    scale = jnp.where(is_cell, 1.0, 0.5).astype(jnp.float32)   # also == alpha
    beta = jnp.where(is_cell, 0.0, 0.5).astype(jnp.float32)

    # Reference quirks mirrored: c0 = h0 (not zeros); hidden bias bh unused.
    h = h0_ref[...]                             # (B, 2H) = [h_fwd | h_bwd*]
    c = h

    # Fully unrolled serial recurrence; static t keeps the xw slices static.
    for t in range(S):
        gates = xw[t * B:(t + 1) * B, :] + jnp.dot(
            h, wh, preferred_element_type=jnp.float32)          # (B, 8H)
        a = scale * jnp.tanh(scale * gates) + beta
        i_g = a[:, 0 * twoH:1 * twoH]
        f_g = a[:, 1 * twoH:2 * twoH]
        g_g = a[:, 2 * twoH:3 * twoH]
        o_g = a[:, 3 * twoH:4 * twoH]
        c = c * f_g + i_g * g_g
        h = o_g * jnp.tanh(c)

    # `h` is already the reference's combined output: [fwd | flip(bwd, batch)]
    # because the batch flip was folded into the backward inputs/initial state.
    logits = (jnp.dot(h, wo_ref[...], preferred_element_type=jnp.float32)
              + bo_ref[...])                                    # (B, O)
    m = jnp.max(logits, axis=1, keepdims=True)
    e = jnp.exp(logits - m)
    sm = e / jnp.sum(e, axis=1, keepdims=True)   # exact softmax (no approx recip)

    # Lane-dense packed output: [0:2H)=combined, [2H:2H+O)=softmax, rest zero.
    O = logits.shape[1]
    pad = out_ref.shape[1] - twoH - O
    pieces = [h, sm]
    if pad > 0:
        pieces.append(jnp.zeros((B, pad), jnp.float32))
    out_ref[...] = jnp.concatenate(pieces, axis=1).astype(out_ref.dtype)


# --------------------------------------------------------------- wrapper ----

def _expand_gate_cols(W, H, half):
    """Place each H-wide gate chunk of W (.., 4H) into the fwd (half=0) or bwd
    (half=1) window of the gate-major fused (.., 8H) layout; zeros elsewhere."""
    R = W.shape[0]
    out = jnp.zeros((R, 8 * H), W.dtype)
    for g in range(4):
        out = out.at[:, g * 2 * H + half * H: g * 2 * H + (half + 1) * H].set(
            W[:, g * H:(g + 1) * H])
    return out


def bilstm_forward(x, h0, params):
    """Mirrors BiLSTM.forward: returns (class_output, combined_output)."""
    S, B, D = x.shape
    H = h0.shape[1]
    O = params["Wo"].shape[1]
    PACK = max(128, -(-(2 * H + O) // 128) * 128)   # lane-dense output width

    # ---- one-time, off-kernel parameter / input fusion (tiny XLA ops) ------
    # Gate-major fused column order: [i_f i_b | f_f f_b | g_f g_b | o_f o_b].
    wi_fused = jnp.concatenate(
        [_expand_gate_cols(params["fwd_Wi"], H, 0),
         _expand_gate_cols(params["bwd_Wi"], H, 1)], axis=0)        # (2D, 8H)
    wh_fused = jnp.concatenate(
        [_expand_gate_cols(params["fwd_Wh"], H, 0),
         _expand_gate_cols(params["bwd_Wh"], H, 1)], axis=0)        # (2H, 8H)
    bi_fused = (_expand_gate_cols(params["fwd_bi"].reshape(1, 4 * H), H, 0)
                + _expand_gate_cols(params["bwd_bi"].reshape(1, 4 * H), H, 1))

    # Backward direction consumes x time-reversed; the reference additionally
    # flips the backward output along the batch axis before the concat.  Batch
    # rows are independent, so fold BOTH flips into the backward inputs and the
    # backward initial state: then the final carried h needs no epilogue flip.
    x_fwd = x.reshape(S * B, D)
    x_bwd = jnp.flip(x, axis=(0, 1)).reshape(S * B, D)
    x_pair = jnp.concatenate([x_fwd, x_bwd], axis=1)                # (S*B, 2D)
    h0_fused = jnp.concatenate([h0, jnp.flip(h0, 0)], axis=1)       # (B, 2H)
    bo2 = params["bo"].reshape(1, O)

    full = lambda i: (0, 0)
    cost = pl.CostEstimate(
        flops=int(2 * S * B * (2 * D) * (8 * H)          # fused input proj
                  + S * 2 * B * (2 * H) * (8 * H)        # fused recurrence
                  + 2 * B * (2 * H) * O),                # head
        transcendentals=int(S * B * (8 * H + 2 * H) + B * O),
        bytes_accessed=int(4 * (x_pair.size + h0_fused.size + wi_fused.size
                                + wh_fused.size + bi_fused.size
                                + params["Wo"].size + O + B * PACK)))

    packed = pl.pallas_call(
        _bilstm_kernel,
        out_shape=jax.ShapeDtypeStruct((B, PACK), jnp.float32),
        grid_spec=pltpu.PrefetchScalarGridSpec(
            num_scalar_prefetch=0,
            grid=(1,),
            in_specs=[
                pl.BlockSpec((S * B, 2 * D), full),     # packed x (fwd | bwd)
                pl.BlockSpec((B, 2 * H), full),         # fused h0
                pl.BlockSpec((2 * D, 8 * H), full),     # block-diag Wi_fused
                pl.BlockSpec((2 * H, 8 * H), full),     # block-diag Wh_fused
                pl.BlockSpec((1, 8 * H), full),         # fused bi
                pl.BlockSpec((2 * H, O), full),         # Wo
                pl.BlockSpec((1, O), full),             # bo
            ],
            out_specs=pl.BlockSpec((B, PACK), full),
        ),
        compiler_params=pltpu.CompilerParams(
            dimension_semantics=("arbitrary",)),
        cost_estimate=cost,
    )(x_pair, h0_fused, wi_fused, wh_fused, bi_fused, params["Wo"], bo2)

    combined = packed[:, :2 * H]
    class_out = packed[:, 2 * H:2 * H + O]
    return class_out, combined


# --------------------------------------------------------- pure-JAX check ---

def _ref_lstm_dir(x, h0, Wi, Wh, bi):
    h = h0
    c = h0                                    # reference quirk: c0 = h0
    H = h0.shape[1]
    for i in range(x.shape[0]):
        gates = x[i] @ Wi + h @ Wh + bi
        ig = jax.nn.sigmoid(gates[:, 0:H])
        fg = jax.nn.sigmoid(gates[:, H:2 * H])
        gg = jnp.tanh(gates[:, 2 * H:3 * H])
        og = jax.nn.sigmoid(gates[:, 3 * H:4 * H])
        c = c * fg + ig * gg
        h = og * jnp.tanh(c)
    return h


def _ref_bilstm(x, h_t, p):
    hf = _ref_lstm_dir(x, h_t, p["fwd_Wi"], p["fwd_Wh"], p["fwd_bi"])
    hb = _ref_lstm_dir(jnp.flip(x, 0), h_t, p["bwd_Wi"], p["bwd_Wh"], p["bwd_bi"])
    comb = jnp.concatenate([hf, jnp.flip(hb, 0)], axis=1)
    logits = comb @ p["Wo"] + p["bo"]
    return jax.nn.softmax(logits, axis=1), comb


# ------------------------------------------------------------------- main ---

if __name__ == "__main__":
    SEQ, BATCH, INPUT, HIDDEN, OUTPUT = 8, 2, 16, 32, 8
    stdv = 1.0 / HIDDEN ** 0.5

    key = jax.random.PRNGKey(0)
    ks = jax.random.split(key, 10)

    def u(k, shape):
        return jax.random.uniform(k, shape, jnp.float32, -stdv, stdv)

    params = {
        "fwd_Wi": u(ks[0], (INPUT, 4 * HIDDEN)),
        "fwd_Wh": u(ks[1], (HIDDEN, 4 * HIDDEN)),
        "fwd_bi": u(ks[2], (4 * HIDDEN,)),
        "bwd_Wi": u(ks[3], (INPUT, 4 * HIDDEN)),
        "bwd_Wh": u(ks[4], (HIDDEN, 4 * HIDDEN)),
        "bwd_bi": u(ks[5], (4 * HIDDEN,)),
        "Wo": u(ks[6], (2 * HIDDEN, OUTPUT)),
        "bo": u(ks[7], (OUTPUT,)),
    }

    x = jax.random.normal(ks[8], (SEQ, BATCH, INPUT), jnp.float32)
    # Non-zero initial state to also exercise the folded batch-flip of h0
    # (BiLSTM.init_hidden would give zeros; forward() accepts any h_t).
    h0 = 0.1 * jax.random.normal(ks[9], (BATCH, HIDDEN), jnp.float32)

    class_out, combined = bilstm_forward(x, h0, params)
    class_out = jax.block_until_ready(class_out)
    combined = jax.block_until_ready(combined)

    ref_class, ref_comb = _ref_bilstm(x, h0, params)
    assert class_out.shape == (BATCH, OUTPUT)
    assert combined.shape == (BATCH, 2 * HIDDEN)
    assert jnp.allclose(class_out, ref_class, atol=1e-5, rtol=1e-5)
    assert jnp.allclose(combined, ref_comb, atol=1e-5, rtol=1e-5)

    print("KERNEL_OK")
</pallas_src>

<mosaic_0001>
module attributes {stable_mosaic.version = 11 : i64} {
  func.func @_bilstm_kernel(%arg0: i32, %arg1: memref<16x32xf32, #tpu.memory_space<vmem>>, %arg2: memref<2x64xf32, #tpu.memory_space<vmem>>, %arg3: memref<32x256xf32, #tpu.memory_space<vmem>>, %arg4: memref<64x256xf32, #tpu.memory_space<vmem>>, %arg5: memref<1x256xf32, #tpu.memory_space<vmem>>, %arg6: memref<64x8xf32, #tpu.memory_space<vmem>>, %arg7: memref<1x8xf32, #tpu.memory_space<vmem>>, %arg8: memref<2x128xf32, #tpu.memory_space<vmem>>) attributes {dimension_semantics = [#tpu.dimension_semantics<arbitrary>], iteration_bounds = array<i64: 1>, scalar_prefetch = 0 : i64, scratch_operands = 0 : i64, tpu.core_type = #tpu.core_type<tc>, window_params = [{pipeline_mode = #tpu.pipeline_mode<synchronous>, transform_indices = @transform_0, window_bounds = array<i64: 16, 32>}, {pipeline_mode = #tpu.pipeline_mode<synchronous>, transform_indices = @transform_1, window_bounds = array<i64: 2, 64>}, {pipeline_mode = #tpu.pipeline_mode<synchronous>, transform_indices = @transform_2, window_bounds = array<i64: 32, 256>}, {pipeline_mode = #tpu.pipeline_mode<synchronous>, transform_indices = @transform_3, window_bounds = array<i64: 64, 256>}, {pipeline_mode = #tpu.pipeline_mode<synchronous>, transform_indices = @transform_4, window_bounds = array<i64: 1, 256>}, {pipeline_mode = #tpu.pipeline_mode<synchronous>, transform_indices = @transform_5, window_bounds = array<i64: 64, 8>}, {pipeline_mode = #tpu.pipeline_mode<synchronous>, transform_indices = @transform_6, window_bounds = array<i64: 1, 8>}, {pipeline_mode = #tpu.pipeline_mode<synchronous>, transform_indices = @transform_7, window_bounds = array<i64: 2, 128>}]} {
    %c0 = arith.constant 0 : index
    %c0_0 = arith.constant 0 : index
    %0 = vector.load %arg1[%c0, %c0_0] : memref<16x32xf32, #tpu.memory_space<vmem>>, vector<16x32xf32>
    %c0_1 = arith.constant 0 : index
    %c0_2 = arith.constant 0 : index
    %1 = vector.load %arg3[%c0_1, %c0_2] : memref<32x256xf32, #tpu.memory_space<vmem>>, vector<32x256xf32>
    %cst = arith.constant dense<0.000000e+00> : vector<16x256xf32>
    %2 = tpu.matmul %0, %1, %cst {dimension_numbers = #tpu.dot_dimension_numbers<[1], [0], [0], [1], [0, 0, 1, 1], [], []>} : vector<16x32xf32>, vector<32x256xf32>, vector<16x256xf32> -> vector<16x256xf32>
    %c0_3 = arith.constant 0 : index
    %c0_4 = arith.constant 0 : index
    %3 = vector.load %arg5[%c0_3, %c0_4] : memref<1x256xf32, #tpu.memory_space<vmem>>, vector<1x256xf32>
    %4 = vector.broadcast %3 : vector<1x256xf32> to vector<16x256xf32>
    %5 = arith.addf %2, %4 : vector<16x256xf32>
    %c0_5 = arith.constant 0 : index
    %c0_6 = arith.constant 0 : index
    %6 = vector.load %arg4[%c0_5, %c0_6] : memref<64x256xf32, #tpu.memory_space<vmem>>, vector<64x256xf32>
    %7 = tpu.iota {dimensions = array<i32: 1>} : vector<2x256xi32>
    %c128_i32 = arith.constant 128 : i32
    %8 = vector.broadcast %c128_i32 : i32 to vector<2x256xi32>
    %9 = arith.cmpi sge, %7, %8 : vector<2x256xi32>
    %c192_i32 = arith.constant 192 : i32
    %10 = vector.broadcast %c192_i32 : i32 to vector<2x256xi32>
    %11 = arith.cmpi slt, %7, %10 : vector<2x256xi32>
    %12 = arith.andi %9, %11 : vector<2x256xi1>
    %cst_7 = arith.constant 1.000000e+00 : f32
    %cst_8 = arith.constant 5.000000e-01 : f32
    %13 = vector.broadcast %cst_7 : f32 to vector<2x256xf32>
    %14 = vector.broadcast %cst_8 : f32 to vector<2x256xf32>
    %15 = arith.select %12, %13, %14 : vector<2x256xi1>, vector<2x256xf32>
    %cst_9 = arith.constant 0.000000e+00 : f32
    %cst_10 = arith.constant 5.000000e-01 : f32
    %16 = vector.broadcast %cst_9 : f32 to vector<2x256xf32>
    %17 = vector.broadcast %cst_10 : f32 to vector<2x256xf32>
    %18 = arith.select %12, %16, %17 : vector<2x256xi1>, vector<2x256xf32>
    %c0_11 = arith.constant 0 : index
    %c0_12 = arith.constant 0 : index
    %19 = vector.load %arg2[%c0_11, %c0_12] : memref<2x64xf32, #tpu.memory_space<vmem>>, vector<2x64xf32>
    %20 = vector.extract_strided_slice %5 {offsets = [0, 0], sizes = [2, 256], strides = [1, 1]} : vector<16x256xf32> to vector<2x256xf32>
    %cst_13 = arith.constant dense<0.000000e+00> : vector<2x256xf32>
    %21 = tpu.matmul %19, %6, %cst_13 {dimension_numbers = #tpu.dot_dimension_numbers<[1], [0], [0], [1], [0, 0, 1, 1], [], []>} : vector<2x64xf32>, vector<64x256xf32>, vector<2x256xf32> -> vector<2x256xf32>
    %22 = arith.addf %20, %21 : vector<2x256xf32>
    %23 = arith.mulf %15, %22 : vector<2x256xf32>
    %24 = math.tanh %23 : vector<2x256xf32>
    %25 = arith.mulf %15, %24 : vector<2x256xf32>
    %26 = arith.addf %25, %18 : vector<2x256xf32>
    %27 = vector.extract_strided_slice %26 {offsets = [0, 0], sizes = [2, 64], strides = [1, 1]} : vector<2x256xf32> to vector<2x64xf32>
    %28 = vector.extract_strided_slice %26 {offsets = [0, 64], sizes = [2, 64], strides = [1, 1]} : vector<2x256xf32> to vector<2x64xf32>
    %29 = vector.extract_strided_slice %26 {offsets = [0, 128], sizes = [2, 64], strides = [1, 1]} : vector<2x256xf32> to vector<2x64xf32>
    %30 = vector.extract_strided_slice %26 {offsets = [0, 192], sizes = [2, 64], strides = [1, 1]} : vector<2x256xf32> to vector<2x64xf32>
    %31 = arith.mulf %19, %28 : vector<2x64xf32>
    %32 = arith.mulf %27, %29 : vector<2x64xf32>
    %33 = arith.addf %31, %32 : vector<2x64xf32>
    %34 = math.tanh %33 : vector<2x64xf32>
    %35 = arith.mulf %30, %34 : vector<2x64xf32>
    %36 = vector.extract_strided_slice %5 {offsets = [2, 0], sizes = [2, 256], strides = [1, 1]} : vector<16x256xf32> to vector<2x256xf32>
    %cst_14 = arith.constant dense<0.000000e+00> : vector<2x256xf32>
    %37 = tpu.matmul %35, %6, %cst_14 {dimension_numbers = #tpu.dot_dimension_numbers<[1], [0], [0], [1], [0, 0, 1, 1], [], []>} : vector<2x64xf32>, vector<64x256xf32>, vector<2x256xf32> -> vector<2x256xf32>
    %38 = arith.addf %36, %37 : vector<2x256xf32>
    %39 = arith.mulf %15, %38 : vector<2x256xf32>
    %40 = math.tanh %39 : vector<2x256xf32>
    %41 = arith.mulf %15, %40 : vector<2x256xf32>
    %42 = arith.addf %41, %18 : vector<2x256xf32>
    %43 = vector.extract_strided_slice %42 {offsets = [0, 0], sizes = [2, 64], strides = [1, 1]} : vector<2x256xf32> to vector<2x64xf32>
    %44 = vector.extract_strided_slice %42 {offsets = [0, 64], sizes = [2, 64], strides = [1, 1]} : vector<2x256xf32> to vector<2x64xf32>
    %45 = vector.extract_strided_slice %42 {offsets = [0, 128], sizes = [2, 64], strides = [1, 1]} : vector<2x256xf32> to vector<2x64xf32>
    %46 = vector.extract_strided_slice %42 {offsets = [0, 192], sizes = [2, 64], strides = [1, 1]} : vector<2x256xf32> to vector<2x64xf32>
    %47 = arith.mulf %33, %44 : vector<2x64xf32>
    %48 = arith.mulf %43, %45 : vector<2x64xf32>
    %49 = arith.addf %47, %48 : vector<2x64xf32>
    %50 = math.tanh %49 : vector<2x64xf32>
    %51 = arith.mulf %46, %50 : vector<2x64xf32>
    %52 = vector.extract_strided_slice %5 {offsets = [4, 0], sizes = [2, 256], strides = [1, 1]} : vector<16x256xf32> to vector<2x256xf32>
    %cst_15 = arith.constant dense<0.000000e+00> : vector<2x256xf32>
    %53 = tpu.matmul %51, %6, %cst_15 {dimension_numbers = #tpu.dot_dimension_numbers<[1], [0], [0], [1], [0, 0, 1, 1], [], []>} : vector<2x64xf32>, vector<64x256xf32>, vector<2x256xf32> -> vector<2x256xf32>
    %54 = arith.addf %52, %53 : vector<2x256xf32>
    %55 = arith.mulf %15, %54 : vector<2x256xf32>
    %56 = math.tanh %55 : vector<2x256xf32>
    %57 = arith.mulf %15, %56 : vector<2x256xf32>
    %58 = arith.addf %57, %18 : vector<2x256xf32>
    %59 = vector.extract_strided_slice %58 {offsets = [0, 0], sizes = [2, 64], strides = [1, 1]} : vector<2x256xf32> to vector<2x64xf32>
    %60 = vector.extract_strided_slice %58 {offsets = [0, 64], sizes = [2, 64], strides = [1, 1]} : vector<2x256xf32> to vector<2x64xf32>
    %61 = vector.extract_strided_slice %58 {offsets = [0, 128], sizes = [2, 64], strides = [1, 1]} : vector<2x256xf32> to vector<2x64xf32>
    %62 = vector.extract_strided_slice %58 {offsets = [0, 192], sizes = [2, 64], strides = [1, 1]} : vector<2x256xf32> to vector<2x64xf32>
    %63 = arith.mulf %49, %60 : vector<2x64xf32>
    %64 = arith.mulf %59, %61 : vector<2x64xf32>
    %65 = arith.addf %63, %64 : vector<2x64xf32>
    %66 = math.tanh %65 : vector<2x64xf32>
    %67 = arith.mulf %62, %66 : vector<2x64xf32>
    %68 = vector.extract_strided_slice %5 {offsets = [6, 0], sizes = [2, 256], strides = [1, 1]} : vector<16x256xf32> to vector<2x256xf32>
    %cst_16 = arith.constant dense<0.000000e+00> : vector<2x256xf32>
    %69 = tpu.matmul %67, %6, %cst_16 {dimension_numbers = #tpu.dot_dimension_numbers<[1], [0], [0], [1], [0, 0, 1, 1], [], []>} : vector<2x64xf32>, vector<64x256xf32>, vector<2x256xf32> -> vector<2x256xf32>
    %70 = arith.addf %68, %69 : vector<2x256xf32>
    %71 = arith.mulf %15, %70 : vector<2x256xf32>
    %72 = math.tanh %71 : vector<2x256xf32>
    %73 = arith.mulf %15, %72 : vector<2x256xf32>
    %74 = arith.addf %73, %18 : vector<2x256xf32>
    %75 = vector.extract_strided_slice %74 {offsets = [0, 0], sizes = [2, 64], strides = [1, 1]} : vector<2x256xf32> to vector<2x64xf32>
    %76 = vector.extract_strided_slice %74 {offsets = [0, 64], sizes = [2, 64], strides = [1, 1]} : vector<2x256xf32> to vector<2x64xf32>
    %77 = vector.extract_strided_slice %74 {offsets = [0, 128], sizes = [2, 64], strides = [1, 1]} : vector<2x256xf32> to vector<2x64xf32>
    %78 = vector.extract_strided_slice %74 {offsets = [0, 192], sizes = [2, 64], strides = [1, 1]} : vector<2x256xf32> to vector<2x64xf32>
    %79 = arith.mulf %65, %76 : vector<2x64xf32>
    %80 = arith.mulf %75, %77 : vector<2x64xf32>
    %81 = arith.addf %79, %80 : vector<2x64xf32>
    %82 = math.tanh %81 : vector<2x64xf32>
    %83 = arith.mulf %78, %82 : vector<2x64xf32>
    %84 = vector.extract_strided_slice %5 {offsets = [8, 0], sizes = [2, 256], strides = [1, 1]} : vector<16x256xf32> to vector<2x256xf32>
    %cst_17 = arith.constant dense<0.000000e+00> : vector<2x256xf32>
    %85 = tpu.matmul %83, %6, %cst_17 {dimension_numbers = #tpu.dot_dimension_numbers<[1], [0], [0], [1], [0, 0, 1, 1], [], []>} : vector<2x64xf32>, vector<64x256xf32>, vector<2x256xf32> -> vector<2x256xf32>
    %86 = arith.addf %84, %85 : vector<2x256xf32>
    %87 = arith.mulf %15, %86 : vector<2x256xf32>
    %88 = math.tanh %87 : vector<2x256xf32>
    %89 = arith.mulf %15, %88 : vector<2x256xf32>
    %90 = arith.addf %89, %18 : vector<2x256xf32>
    %91 = vector.extract_strided_slice %90 {offsets = [0, 0], sizes = [2, 64], strides = [1, 1]} : vector<2x256xf32> to vector<2x64xf32>
    %92 = vector.extract_strided_slice %90 {offsets = [0, 64], sizes = [2, 64], strides = [1, 1]} : vector<2x256xf32> to vector<2x64xf32>
    %93 = vector.extract_strided_slice %90 {offsets = [0, 128], sizes = [2, 64], strides = [1, 1]} : vector<2x256xf32> to vector<2x64xf32>
    %94 = vector.extract_strided_slice %90 {offsets = [0, 192], sizes = [2, 64], strides = [1, 1]} : vector<2x256xf32> to vector<2x64xf32>
    %95 = arith.mulf %81, %92 : vector<2x64xf32>
    %96 = arith.mulf %91, %93 : vector<2x64xf32>
    %97 = arith.addf %95, %96 : vector<2x64xf32>
    %98 = math.tanh %97 : vector<2x64xf32>
    %99 = arith.mulf %94, %98 : vector<2x64xf32>
    %100 = vector.extract_strided_slice %5 {offsets = [10, 0], sizes = [2, 256], strides = [1, 1]} : vector<16x256xf32> to vector<2x256xf32>
    %cst_18 = arith.constant dense<0.000000e+00> : vector<2x256xf32>
    %101 = tpu.matmul %99, %6, %cst_18 {dimension_numbers = #tpu.dot_dimension_numbers<[1], [0], [0], [1], [0, 0, 1, 1], [], []>} : vector<2x64xf32>, vector<64x256xf32>, vector<2x256xf32> -> vector<2x256xf32>
    %102 = arith.addf %100, %101 : vector<2x256xf32>
    %103 = arith.mulf %15, %102 : vector<2x256xf32>
    %104 = math.tanh %103 : vector<2x256xf32>
    %105 = arith.mulf %15, %104 : vector<2x256xf32>
    %106 = arith.addf %105, %18 : vector<2x256xf32>
    %107 = vector.extract_strided_slice %106 {offsets = [0, 0], sizes = [2, 64], strides = [1, 1]} : vector<2x256xf32> to vector<2x64xf32>
    %108 = vector.extract_strided_slice %106 {offsets = [0, 64], sizes = [2, 64], strides = [1, 1]} : vector<2x256xf32> to vector<2x64xf32>
    %109 = vector.extract_strided_slice %106 {offsets = [0, 128], sizes = [2, 64], strides = [1, 1]} : vector<2x256xf32> to vector<2x64xf32>
    %110 = vector.extract_strided_slice %106 {offsets = [0, 192], sizes = [2, 64], strides = [1, 1]} : vector<2x256xf32> to vector<2x64xf32>
    %111 = arith.mulf %97, %108 : vector<2x64xf32>
    %112 = arith.mulf %107, %109 : vector<2x64xf32>
    %113 = arith.addf %111, %112 : vector<2x64xf32>
    %114 = math.tanh %113 : vector<2x64xf32>
    %115 = arith.mulf %110, %114 : vector<2x64xf32>
    %116 = vector.extract_strided_slice %5 {offsets = [12, 0], sizes = [2, 256], strides = [1, 1]} : vector<16x256xf32> to vector<2x256xf32>
    %cst_19 = arith.constant dense<0.000000e+00> : vector<2x256xf32>
    %117 = tpu.matmul %115, %6, %cst_19 {dimension_numbers = #tpu.dot_dimension_numbers<[1], [0], [0], [1], [0, 0, 1, 1], [], []>} : vector<2x64xf32>, vector<64x256xf32>, vector<2x256xf32> -> vector<2x256xf32>
    %118 = arith.addf %116, %117 : vector<2x256xf32>
    %119 = arith.mulf %15, %118 : vector<2x256xf32>
    %120 = math.tanh %119 : vector<2x256xf32>
    %121 = arith.mulf %15, %120 : vector<2x256xf32>
    %122 = arith.addf %121, %18 : vector<2x256xf32>
    %123 = vector.extract_strided_slice %122 {offsets = [0, 0], sizes = [2, 64], strides = [1, 1]} : vector<2x256xf32> to vector<2x64xf32>
    %124 = vector.extract_strided_slice %122 {offsets = [0, 64], sizes = [2, 64], strides = [1, 1]} : vector<2x256xf32> to vector<2x64xf32>
    %125 = vector.extract_strided_slice %122 {offsets = [0, 128], sizes = [2, 64], strides = [1, 1]} : vector<2x256xf32> to vector<2x64xf32>
    %126 = vector.extract_strided_slice %122 {offsets = [0, 192], sizes = [2, 64], strides = [1, 1]} : vector<2x256xf32> to vector<2x64xf32>
    %127 = arith.mulf %113, %124 : vector<2x64xf32>
    %128 = arith.mulf %123, %125 : vector<2x64xf32>
    %129 = arith.addf %127, %128 : vector<2x64xf32>
    %130 = math.tanh %129 : vector<2x64xf32>
    %131 = arith.mulf %126, %130 : vector<2x64xf32>
    %132 = vector.extract_strided_slice %5 {offsets = [14, 0], sizes = [2, 256], strides = [1, 1]} : vector<16x256xf32> to vector<2x256xf32>
    %cst_20 = arith.constant dense<0.000000e+00> : vector<2x256xf32>
    %133 = tpu.matmul %131, %6, %cst_20 {dimension_numbers = #tpu.dot_dimension_numbers<[1], [0], [0], [1], [0, 0, 1, 1], [], []>} : vector<2x64xf32>, vector<64x256xf32>, vector<2x256xf32> -> vector<2x256xf32>
    %134 = arith.addf %132, %133 : vector<2x256xf32>
    %135 = arith.mulf %15, %134 : vector<2x256xf32>
    %136 = math.tanh %135 : vector<2x256xf32>
    %137 = arith.mulf %15, %136 : vector<2x256xf32>
    %138 = arith.addf %137, %18 : vector<2x256xf32>
    %139 = vector.extract_strided_slice %138 {offsets = [0, 0], sizes = [2, 64], strides = [1, 1]} : vector<2x256xf32> to vector<2x64xf32>
    %140 = vector.extract_strided_slice %138 {offsets = [0, 64], sizes = [2, 64], strides = [1, 1]} : vector<2x256xf32> to vector<2x64xf32>
    %141 = vector.extract_strided_slice %138 {offsets = [0, 128], sizes = [2, 64], strides = [1, 1]} : vector<2x256xf32> to vector<2x64xf32>
    %142 = vector.extract_strided_slice %138 {offsets = [0, 192], sizes = [2, 64], strides = [1, 1]} : vector<2x256xf32> to vector<2x64xf32>
    %143 = arith.mulf %129, %140 : vector<2x64xf32>
    %144 = arith.mulf %139, %141 : vector<2x64xf32>
    %145 = arith.addf %143, %144 : vector<2x64xf32>
    %146 = math.tanh %145 : vector<2x64xf32>
    %147 = arith.mulf %142, %146 : vector<2x64xf32>
    %c0_21 = arith.constant 0 : index
    %c0_22 = arith.constant 0 : index
    %148 = vector.load %arg6[%c0_21, %c0_22] : memref<64x8xf32, #tpu.memory_space<vmem>>, vector<64x8xf32>
    %cst_23 = arith.constant dense<0.000000e+00> : vector<2x8xf32>
    %149 = tpu.matmul %147, %148, %cst_23 {dimension_numbers = #tpu.dot_dimension_numbers<[1], [0], [0], [1], [0, 0, 1, 1], [], []>} : vector<2x64xf32>, vector<64x8xf32>, vector<2x8xf32> -> vector<2x8xf32>
    %c0_24 = arith.constant 0 : index
    %c0_25 = arith.constant 0 : index
    %150 = vector.load %arg7[%c0_24, %c0_25] : memref<1x8xf32, #tpu.memory_space<vmem>>, vector<1x8xf32>
    %151 = vector.broadcast %150 : vector<1x8xf32> to vector<2x8xf32>
    %152 = arith.addf %149, %151 : vector<2x8xf32>
    %cst_26 = arith.constant dense<0xFF800000> : vector<2xf32>
    %153 = vector.multi_reduction <maximumf>, %152, %cst_26 [1] : vector<2x8xf32> to vector<2xf32>
    %154 = vector.shape_cast %153 : vector<2xf32> to vector<2x1xf32>
    %155 = vector.broadcast %154 : vector<2x1xf32> to vector<2x8xf32>
    %156 = arith.subf %152, %155 : vector<2x8xf32>
    %157 = math.exp %156 : vector<2x8xf32>
    %cst_27 = arith.constant dense<0.000000e+00> : vector<2xf32>
    %158 = vector.multi_reduction <add>, %157, %cst_27 [1] : vector<2x8xf32> to vector<2xf32>
    %159 = vector.shape_cast %158 : vector<2xf32> to vector<2x1xf32>
    %160 = vector.broadcast %159 : vector<2x1xf32> to vector<2x8xf32>
    %161 = arith.divf %157, %160 : vector<2x8xf32>
    %cst_28 = arith.constant 0.000000e+00 : f32
    %162 = vector.broadcast %cst_28 : f32 to vector<2x56xf32>
    %163 = tpu.concatenate %147, %161, %162 in 1 : vector<2x64xf32>, vector<2x8xf32>, vector<2x56xf32> -> vector<2x128xf32>
    %c0_29 = arith.constant 0 : index
    %c0_30 = arith.constant 0 : index
    %164 = vector.load %arg8[%c0_29, %c0_30] : memref<2x128xf32, #tpu.memory_space<vmem>>, vector<2x128xf32>
    tpu.vector_store %arg8[%c0_29, %c0_30], %163 {strides = array<i32>} : memref<2x128xf32, #tpu.memory_space<vmem>>, vector<2x128xf32>,
    return
  }
  func.func @transform_0(%arg0: i32) -> (i32, i32) {
    %c0_i32 = arith.constant 0 : i32
    %c0_i32_0 = arith.constant 0 : i32
    %c0_i32_1 = arith.constant 0 : i32
    return %c0_i32, %c0_i32_0 : i32, i32
  }
  func.func @transform_1(%arg0: i32) -> (i32, i32) {
    %c0_i32 = arith.constant 0 : i32
    %c0_i32_0 = arith.constant 0 : i32
    %c0_i32_1 = arith.constant 0 : i32
    return %c0_i32, %c0_i32_0 : i32, i32
  }
  func.func @transform_2(%arg0: i32) -> (i32, i32) {
    %c0_i32 = arith.constant 0 : i32
    %c0_i32_0 = arith.constant 0 : i32
    %c0_i32_1 = arith.constant 0 : i32
    return %c0_i32, %c0_i32_0 : i32, i32
  }
  func.func @transform_3(%arg0: i32) -> (i32, i32) {
    %c0_i32 = arith.constant 0 : i32
    %c0_i32_0 = arith.constant 0 : i32
    %c0_i32_1 = arith.constant 0 : i32
    return %c0_i32, %c0_i32_0 : i32, i32
  }
  func.func @transform_4(%arg0: i32) -> (i32, i32) {
    %c0_i32 = arith.constant 0 : i32
    %c0_i32_0 = arith.constant 0 : i32
    %c0_i32_1 = arith.constant 0 : i32
    return %c0_i32, %c0_i32_0 : i32, i32
  }
  func.func @transform_5(%arg0: i32) -> (i32, i32) {
    %c0_i32 = arith.constant 0 : i32
    %c0_i32_0 = arith.constant 0 : i32
    %c0_i32_1 = arith.constant 0 : i32
    return %c0_i32, %c0_i32_0 : i32, i32
  }
  func.func @transform_6(%arg0: i32) -> (i32, i32) {
    %c0_i32 = arith.constant 0 : i32
    %c0_i32_0 = arith.constant 0 : i32
    %c0_i32_1 = arith.constant 0 : i32
    return %c0_i32, %c0_i32_0 : i32, i32
  }
  func.func @transform_7(%arg0: i32) -> (i32, i32) {
    %c0_i32 = arith.constant 0 : i32
    %c0_i32_0 = arith.constant 0 : i32
    %c0_i32_1 = arith.constant 0 : i32
    return %c0_i32, %c0_i32_0 : i32, i32
  }
}

</mosaic_0001>

<bundles_post_ra>
// kernel: tpu_custom_call.1
= control target key start
LH: loop header
LB: loop body
LE: loop exit
PB: predicated region body
PF: predicated region fallthrough
CT: control target
= control target key end

     0   :  { %12 = vsyncpa [#allocation3], 0  ;;  %s1424_s0 = inlined_call_operand.hbm [shape: f32[16,32], index: 0, kind: input, shape index: {}]   ;;  %s1425_s1 = inlined_call_operand.vmem [shape: f32[2,64], index: 1, kind: input, shape index: {}]   ;;  %s1426_s2 = inlined_call_operand.vmem [shape: f32[32,256], index: 2, kind: input, shape index: {}]   ;;  %s1427_s3 = inlined_call_operand.hbm [shape: f32[64,256], index: 3, kind: input, shape index: {}]   ;;  %s1428_s4 = inlined_call_operand.vmem [shape: f32[1,256], index: 4, kind: input, shape index: {}]   ;;  %s1429_s5 = inlined_call_operand.vmem [shape: f32[64,8], index: 5, kind: input, shape index: {}]   ;;  %s1430_s6 = inlined_call_operand.vmem [shape: f32[1,8], index: 6, kind: input, shape index: {}]   ;;  %s1431_s7 = inlined_call_operand.hbm [shape: f32[2,128], index: 7, kind: output, shape index: {}]  }
   0x1   :  { %13 = vsyncpa [#allocation6], 0 }
   0x2   :  { %14 = vsyncpa [#allocation4], 0  ;;  %s19_s26 = sshll.u32 %s1424_s0, 4  ;;  %s1026_s27 = smov [#allocation2]   ;;  %s20_s26 = int_to_ptr.hbm [resolvable:$true] %s19_s26 }
   0x3   :  { %s21_s28 = sshll.u32 %s1026_s27, 4  ;;  %s36_s8 = sshll.u32 %s1427_s3, 4  ;;  %s22_s28 = int_to_ptr.vmem [resolvable:$true] %s21_s28  ;;  %s37_s8 = int_to_ptr.hbm [resolvable:$true] %s36_s8 }
   0x4   :  { %s1027_s9 = smov 128   ;;  %s1028_s10 = smov 8  }
   0x5   :  { %27 = dma.hbm_to_vmem [thread:$0]  %s20_s26, 256, %s22_s28, [#allocation3], %s1027_s9, %s1027_s9, %s1028_s10  }
   0x6   :  { %s1029_s11 = smov [#allocation5]   ;;  %s1030_s13 = smov 256  }
   0x7   :  { %s38_s12 = sshll.u32 %s1029_s11, 4  ;;  %s1031_s14 = smov 16   ;;  %s39_s12 = int_to_ptr.vmem [resolvable:$true] %s38_s12 }
   0x8   :  { %44 = dma.hbm_to_vmem [thread:$0]  %s37_s8, 2048, %s39_s12, [#allocation6], %s1030_s13, %s1030_s13, %s1031_s14  }
   0x9   :  { %1020 = dma.done.wait [#allocation3], 256  }
   0xa   :  { %1021 = vsyncadd [#allocation3], 4294967040 }
   0xb   :  { %1022 = dma.done.wait [#allocation6], 2048  }
   0xc   :  { %1023 = vsyncadd [#allocation6], 4294965248  ;;  %v1081_v0 = vld [vmem:[#allocation5 + $0x70] sm:$0xff]  ;;  %v1083_v1 = vld [vmem:[#allocation5 + $0x78] sm:$0xff]  ;;  %vm75_vm0 = vcmask 261120   ;;  %vm158_vm1 = vcmask 523264   ;;  %v144_v36 = vlaneseq }
   0xd   :  { %v1085_v2 = vld [vmem:[#allocation5 + $0x60] sm:$0xff]  ;;  %170 = vmatpush.msra.mxu2 %v1081_v0  ;;  %190 = vmatpush.msra.mxu3 %v1083_v1  ;;  %v1089_v3 = vld [vmem:[#allocation5 + $0x68] sm:$0xff]  ;;  %v1091_v4 = vld [vmem:[#allocation5 + $0x50] sm:$0xff]  ;;  %s1032_s8 = smov 64   ;;  %v1033_v44 = vmov 0.5   ;;  %vm810_vm3 = vcmask 58368  }
   0xe   :  { %v1093_v5 = vld [vmem:[#allocation5 + $0x58] sm:$0xff]  ;;  %v1097_v6 = vld [vmem:[#allocation5 + $0x40] sm:$0xff]  ;;  %v1099_v7 = vld [vmem:[#allocation5 + $0x48] sm:$0xff]  ;;  %v145_v37 = vand.u32 127, %v144_v36  ;;  %s854_s26 = sshll.u32 %s1431_s7, 4  ;;  %vm844_vm8 = vcmask 588800   ;;  %s855_s26 = int_to_ptr.hbm [resolvable:$true] %s854_s26 }
   0xf   :  { %171 = vmatpush.msra.mxu2 %v1085_v2  ;;  %191 = vmatpush.msra.mxu3 %v1089_v3  ;;  %v67_v8 = vld [vmem:[%s1426_s2 + $0x30] sm:$0xff]  ;;  %v68_v9 = vld [vmem:[%s1426_s2 + $0x38] sm:$0xff]  ;;  %v65_v10 = vld [vmem:[%s1426_s2 + $0x20] sm:$0xff] }
  0x10   :  { %v66_v11 = vld [vmem:[%s1426_s2 + $0x28] sm:$0xff]  ;;  %v1115_v12 = vld [vmem:[#allocation5 + $0x30] sm:$0xff]  ;;  %94 = vmatpush.msra.mxu0 %v67_v8  ;;  %117 = vmatpush.msra.mxu1 %v68_v9  ;;  %v63_v14 = vld [vmem:[%s1426_s2 + $0x10] sm:$0xff]  ;;  %v146_v40 = vadd.s32 128, %v145_v37 }
  0x11   :  { %172 = vmatpush.msra.mxu2 %v1091_v4  ;;  %192 = vmatpush.msra.mxu3 %v1093_v5  ;;  %v1117_v13 = vld [vmem:[#allocation5 + $0x38] sm:$0xff]  ;;  %v64_v15 = vld [vmem:[%s1426_s2 + $0x18] sm:$0xff]  ;;  %v1127_v16 = vld [vmem:[#allocation5 + $0x20] sm:$0xff] }
  0x12   :  { %v1129_v17 = vld [vmem:[#allocation5 + $0x28] sm:$0xff]  ;;  %95 = vmatpush.msra.mxu0 %v65_v10  ;;  %118 = vmatpush.msra.mxu1 %v66_v11  ;;  %v61_v18 = vld [vmem:[%s1426_s2] sm:$0xff]  ;;  %v62_v19 = vld [vmem:[%s1426_s2 + $0x8] sm:$0xff]  ;;  %vm150_vm2 = vcmp.lt.s32.totalorder %v146_v40, 192 }
  0x13   :  { %173 = vmatpush.msra.mxu2 %v1097_v6  ;;  %193 = vmatpush.msra.mxu3 %v1099_v7  ;;  %v1139_v20 = vld [vmem:[#allocation5 + $0x10] sm:$0xff]  ;;  %v1141_v21 = vld [vmem:[#allocation5 + $0x18] sm:$0xff]  ;;  %v1145_v23 = vld [vmem:[#allocation5] sm:$0xff]  ;;  %v1246_v45 = vsel %vm150_vm2, 1.0, %v1033_v44  ;;  %v1250_v49 = vsel %vm150_vm2, 0.0, %v1033_v44 }
  0x14   :  { %96 = vmatpush.msra.mxu0 %v63_v14  ;;  %119 = vmatpush.msra.mxu1 %v64_v15  ;;  %v59_v22 = vld [vmem:[#allocation2] sm:$0xff]  ;;  %v1147_v24 = vld [vmem:[#allocation5 + $0x8] sm:$0xff]  ;;  %v60_v56 = vld [vmem:[#allocation2 + $0x8] sm:$0xff] }
  0x15   :  { %174 = vmatpush.msra.mxu2 %v1115_v12  ;;  %194 = vmatpush.msra.mxu3 %v1117_v13  ;;  %v1154_v25 = vld [vmem:[%s1425_s1] sm:$0x3] }
  0x16   :  { %97 = vmatpush.msra.mxu0 %v61_v18  ;;  %120 = vmatpush.msra.mxu1 %v62_v19  ;;  %v1231_v26 = vld [vmem:[%s1428_s4] sm:$0x3] }
  0x17   :  { %175 = vmatpush.msra.mxu2 %v1127_v16  ;;  %195 = vmatpush.msra.mxu3 %v1129_v17  ;;  %v71_v27 = vperm.slane %v1231_v26, 0  ;;  %v72_v38 = vperm.slane %v1231_v26, 1 }
  0x18   :  { %865 = vmatmul.msk.f32.vlgmr.msra.gmra.mxu0 %vm75_vm0, %v59_v22  ;;  %867 = vmatmul.msk.f32.vlgmr.msra.gmra.mxu1 %vm75_vm0, %v59_v22 }
  0x19   :  { %176 = vmatpush.msra.mxu2 %v1139_v20  ;;  %196 = vmatpush.msra.mxu3 %v1141_v21 }
  0x1a   :  { %238 = vmatpush.msrb.mxu0 %v1081_v0  ;;  %258 = vmatpush.msrb.mxu1 %v1083_v1 }
  0x1b   :  { %177 = vmatpush.msra.mxu2 %v1145_v23  ;;  %197 = vmatpush.msra.mxu3 %v1147_v24 }
  0x1c   :  { %869 = vmatmul.msk.f32.vlgmr.msra.gmra.mxu2 %vm158_vm1, %v1154_v25  ;;  %870 = vmatmul.msk.f32.vlgmr.msra.gmra.mxu3 %vm158_vm1, %v1154_v25 }
  0x1d   :  { %318 = vmatpush.msrb.mxu2 %v1081_v0  ;;  %338 = vmatpush.msrb.mxu3 %v1083_v1 }
  0x1e   :  { %239 = vmatpush.msrb.mxu0 %v1085_v2  ;;  %259 = vmatpush.msrb.mxu1 %v1089_v3 }
  0x1f   :  { %319 = vmatpush.msrb.mxu2 %v1085_v2  ;;  %339 = vmatpush.msrb.mxu3 %v1089_v3 }
  0x20   :  { %240 = vmatpush.msrb.mxu0 %v1091_v4  ;;  %260 = vmatpush.msrb.mxu1 %v1093_v5 }
  0x21   :  { %320 = vmatpush.msrb.mxu2 %v1091_v4  ;;  %340 = vmatpush.msrb.mxu3 %v1093_v5 }
  0x22   :  { %241 = vmatpush.msrb.mxu0 %v1097_v6  ;;  %261 = vmatpush.msrb.mxu1 %v1099_v7 }
  0x23   :  { %321 = vmatpush.msrb.mxu2 %v1097_v6  ;;  %341 = vmatpush.msrb.mxu3 %v1099_v7 }
  0x24   :  { %242 = vmatpush.msrb.mxu0 %v1115_v12  ;;  %262 = vmatpush.msrb.mxu1 %v1117_v13 }
  0x25   :  { %322 = vmatpush.msrb.mxu2 %v1115_v12  ;;  %342 = vmatpush.msrb.mxu3 %v1117_v13 }
  0x26   :  { %243 = vmatpush.msrb.mxu0 %v1127_v16  ;;  %263 = vmatpush.msrb.mxu1 %v1129_v17 }
  0x27   :  { %323 = vmatpush.msrb.mxu2 %v1127_v16  ;;  %343 = vmatpush.msrb.mxu3 %v1129_v17 }
  0x28   :  { %244 = vmatpush.msrb.mxu0 %v1139_v20  ;;  %264 = vmatpush.msrb.mxu1 %v1141_v21 }
  0x29   :  { %324 = vmatpush.msrb.mxu2 %v1139_v20  ;;  %344 = vmatpush.msrb.mxu3 %v1141_v21 }
  0x2a   :  { %245 = vmatpush.msrb.mxu0 %v1145_v23  ;;  %265 = vmatpush.msrb.mxu1 %v1147_v24 }
  0x2b   :  { %325 = vmatpush.msrb.mxu2 %v1145_v23  ;;  %345 = vmatpush.msrb.mxu3 %v1147_v24 }
  0x2c   :  { %398 = vmatpush.msra.mxu0 %v1081_v0  ;;  %418 = vmatpush.msra.mxu1 %v1083_v1 }
  0x2d   :  { %478 = vmatpush.msra.mxu2 %v1081_v0  ;;  %498 = vmatpush.msra.mxu3 %v1083_v1 }
  0x2e   :  { %399 = vmatpush.msra.mxu0 %v1085_v2  ;;  %419 = vmatpush.msra.mxu1 %v1089_v3 }
  0x2f   :  { %479 = vmatpush.msra.mxu2 %v1085_v2  ;;  %499 = vmatpush.msra.mxu3 %v1089_v3 }
  0x30   :  { %400 = vmatpush.msra.mxu0 %v1091_v4  ;;  %420 = vmatpush.msra.mxu1 %v1093_v5 }
  0x31   :  { %480 = vmatpush.msra.mxu2 %v1091_v4  ;;  %500 = vmatpush.msra.mxu3 %v1093_v5 }
  0x32   :  { %401 = vmatpush.msra.mxu0 %v1097_v6  ;;  %421 = vmatpush.msra.mxu1 %v1099_v7 }
  0x33   :  { %481 = vmatpush.msra.mxu2 %v1097_v6  ;;  %501 = vmatpush.msra.mxu3 %v1099_v7 }
  0x34   :  { %402 = vmatpush.msra.mxu0 %v1115_v12  ;;  %422 = vmatpush.msra.mxu1 %v1117_v13 }
  0x35   :  { %482 = vmatpush.msra.mxu2 %v1115_v12  ;;  %502 = vmatpush.msra.mxu3 %v1117_v13 }
  0x36   :  { %403 = vmatpush.msra.mxu0 %v1127_v16  ;;  %423 = vmatpush.msra.mxu1 %v1129_v17 }
  0x37   :  { %483 = vmatpush.msra.mxu2 %v1127_v16  ;;  %503 = vmatpush.msra.mxu3 %v1129_v17 }
  0x38   :  { %404 = vmatpush.msra.mxu0 %v1139_v20  ;;  %424 = vmatpush.msra.mxu1 %v1141_v21 }
  0x39   :  { %484 = vmatpush.msra.mxu2 %v1139_v20  ;;  %504 = vmatpush.msra.mxu3 %v1141_v21 }
  0x3a   :  { %405 = vmatpush.msra.mxu0 %v1145_v23  ;;  %425 = vmatpush.msra.mxu1 %v1147_v24 }
  0x3b   :  { %485 = vmatpush.msra.mxu2 %v1145_v23  ;;  %505 = vmatpush.msra.mxu3 %v1147_v24 }
  0x3c   :  { %866 = vmatmul.msk.f32.gmra.mxu0 %vm75_vm0, %v60_v56  ;;  %868 = vmatmul.msk.f32.gmra.mxu1 %vm75_vm0, %v60_v56 }
  0x95   :  { %v99_v28 = vpop.f32.mrf.mxu0  ;;  %v122_v39 = vpop.f32.mrf.mxu1 }
  0x96   :  { %v1236_v29 = vadd.f32 %v99_v28, %v71_v27  ;;  %v1243_v41 = vadd.f32 %v122_v39, %v72_v38 }
  0x9f   :  { %v179_v30 = vpop.f32.mrf.mxu2  ;;  %v199_v42 = vpop.f32.mrf.mxu3 }
  0xa0   :  { %v202_v31 = vadd.f32 %v179_v30, %v1236_v29  ;;  %v203_v43 = vadd.f32 %v199_v42, %v1243_v41 }
  0xa2   :  { %v204_v32 = vmul.f32 0.5, %v202_v31  ;;  %v205_v46 = vmul.f32 %v203_v43, %v1246_v45 }
  0xa4   :  { %896 = vtanh.f32 %v204_v32 }
  0xa5   :  { %898 = vtanh.f32 %v205_v46 }
  0xaa   :  { %v897_v33 = vpop.eup %896 }
  0xab   :  { %v208_v34 = vmul.f32 0.5, %v897_v33  ;;  %v899_v47 = vpop.eup %898 }
  0xac   :  { %v209_v48 = vmul.f32 %v899_v47, %v1246_v45 }
  0xad   :  { %v210_v35 = vadd.f32 0.5, %v208_v34 }
  0xae   :  { %v211_v50 = vadd.f32 %v209_v48, %v1250_v49 }
  0xaf   :  { %213 = vrot.lane.b32.xlu0 %v210_v35, %s1032_s8 }
  0xb0   :  { %v217_v52 = vmul.f32 %v211_v50, %v210_v35 }
  0xb9   :  { %v1276_v60 = vpop.f32.mrf.mxu0  ;;  %v1280_v15 = vpop.f32.mrf.mxu1 }
 0x121   :  { %v214_v51 = vpop.permute.xlu0 %213 }
 0x122   :  { %v216_v53 = vmul.f32 %v214_v51, %v1154_v25 }
 0x124   :  { %v218_v54 = vadd.f32 %v217_v52, %v216_v53 }
 0x126   :  { %900 = vtanh.f32 %v218_v54 }
 0x12c   :  { %v901_v55 = vpop.eup %900 }
 0x12d   :  { %221 = vrot.lane.b32.xlu0 %v901_v55, %s1032_s8 }
 0x19f   :  { %v222_v57 = vpop.permute.xlu0 %221 }
 0x1a0   :  { %v224_v58 = vmul.f32 %v222_v57, %v211_v50 }
 0x1a2   :  { %226 = vrot.lane.b32.xlu1 %v224_v58, %s1032_s8 }
 0x214   :  { %v227_v59 = vpop.permute.xlu1 %226 }
 0x215   :  { %871 = vmatmul.msk.f32.vlgmr.msrb.gmra.mxu0 %vm158_vm1, %v227_v59  ;;  %872 = vmatmul.msk.f32.vlgmr.msrb.gmra.mxu1 %vm158_vm1, %v227_v59 }
 0x216   :  { %546 = vmatpush.msrb.mxu0 %v1081_v0  ;;  %566 = vmatpush.msrb.mxu1 %v1083_v1 }
 0x218   :  { %547 = vmatpush.msrb.mxu0 %v1085_v2  ;;  %567 = vmatpush.msrb.mxu1 %v1089_v3 }
 0x21a   :  { %548 = vmatpush.msrb.mxu0 %v1091_v4  ;;  %568 = vmatpush.msrb.mxu1 %v1093_v5 }
 0x21c   :  { %549 = vmatpush.msrb.mxu0 %v1097_v6  ;;  %569 = vmatpush.msrb.mxu1 %v1099_v7 }
 0x21e   :  { %550 = vmatpush.msrb.mxu0 %v1115_v12  ;;  %570 = vmatpush.msrb.mxu1 %v1117_v13 }
 0x220   :  { %551 = vmatpush.msrb.mxu0 %v1127_v16  ;;  %571 = vmatpush.msrb.mxu1 %v1129_v17 }
 0x222   :  { %552 = vmatpush.msrb.mxu0 %v1139_v20  ;;  %572 = vmatpush.msrb.mxu1 %v1141_v21 }
 0x224   :  { %553 = vmatpush.msrb.mxu0 %v1145_v23  ;;  %573 = vmatpush.msrb.mxu1 %v1147_v24 }
 0x292   :  { %v247_v61 = vpop.f32.mrf.mxu0  ;;  %v267_v18 = vpop.f32.mrf.mxu1 }
 0x293   :  { %v272_v62 = vrot.slane %v247_v61, 6  ;;  %v273_v19 = vrot.slane %v267_v18, 6 }
 0x295   :  { %v276_v63 = vadd.f32 %v272_v62, %v1236_v29  ;;  %v277_v22 = vadd.f32 %v273_v19, %v1243_v41 }
 0x297   :  { %v278_v8 = vmul.f32 0.5, %v276_v63  ;;  %v279_v25 = vmul.f32 %v277_v22, %v1246_v45 }
 0x299   :  { %902 = vtanh.f32 %v278_v8 }
 0x29a   :  { %904 = vtanh.f32 %v279_v25 }
 0x29f   :  { %v903_v9 = vpop.eup %902 }
 0x2a0   :  { %v282_v10 = vmul.f32 0.5, %v903_v9  ;;  %v905_v28 = vpop.eup %904 }
 0x2a1   :  { %v283_v30 = vmul.f32 %v905_v28, %v1246_v45 }
 0x2a2   :  { %v284_v11 = vadd.f32 0.5, %v282_v10 }
 0x2a3   :  { %v285_v31 = vadd.f32 %v283_v30, %v1250_v49 }
 0x2a4   :  { %v287_v14 = vrot.slane %v284_v11, 2 }
 0x2a5   :  { %v292_v32 = vmul.f32 %v285_v31, %v284_v11 }
 0x2a6   :  { %288 = vrot.lane.b32.xlu1 %v287_v14, %s1032_s8 }
 0x2a7   :  { %v294_v34 = vrot.slane %v292_v32, 2 }
 0x318   :  { %v289_v33 = vpop.permute.xlu1 %288 }
 0x319   :  { %v291_v35 = vmul.f32 %v289_v33, %v218_v54 }
 0x31b   :  { %v296_v36 = vadd.f32 %v294_v34, %v291_v35 }
 0x31d   :  { %906 = vtanh.f32 %v296_v36 }
 0x323   :  { %v907_v37 = vpop.eup %906 }
 0x324   :  { %v299_v39 = vrot.slane %v907_v37, 6 }
 0x326   :  { %300 = vrot.lane.b32.xlu2 %v299_v39, %s1032_s8  ;;  %v1345_v39 = vadd.f32 %v1276_v60, %v71_v27 }
 0x380   :  { %v301_v40 = vpop.permute.xlu2 %300 }
 0x381   :  { %v303_v42 = vmul.f32 %v301_v40, %v285_v31 }
 0x383   :  { %v305_v43 = vrot.slane %v303_v42, 2 }
 0x385   :  { %306 = vrot.lane.b32.xlu2 %v305_v43, %s1032_s8 }
 0x3df   :  { %v307_v44 = vpop.permute.xlu2 %306 }
 0x3e0   :  { %873 = vmatmul.msk.f32.vlgmr.msrb.gmra.mxu2 %vm158_vm1, %v307_v44  ;;  %874 = vmatmul.msk.f32.vlgmr.msrb.gmra.mxu3 %vm158_vm1, %v307_v44 }
 0x3e1   :  { %626 = vmatpush.msrb.mxu2 %v1081_v0  ;;  %646 = vmatpush.msrb.mxu3 %v1083_v1 }
 0x3e3   :  { %627 = vmatpush.msrb.mxu2 %v1085_v2  ;;  %647 = vmatpush.msrb.mxu3 %v1089_v3 }
 0x3e5   :  { %628 = vmatpush.msrb.mxu2 %v1091_v4  ;;  %648 = vmatpush.msrb.mxu3 %v1093_v5 }
 0x3e7   :  { %629 = vmatpush.msrb.mxu2 %v1097_v6  ;;  %649 = vmatpush.msrb.mxu3 %v1099_v7 }
 0x3e9   :  { %630 = vmatpush.msrb.mxu2 %v1115_v12  ;;  %650 = vmatpush.msrb.mxu3 %v1117_v13 }
 0x3eb   :  { %631 = vmatpush.msrb.mxu2 %v1127_v16  ;;  %651 = vmatpush.msrb.mxu3 %v1129_v17 }
 0x3ed   :  { %632 = vmatpush.msrb.mxu2 %v1139_v20  ;;  %652 = vmatpush.msrb.mxu3 %v1141_v21 }
 0x3ef   :  { %633 = vmatpush.msrb.mxu2 %v1145_v23  ;;  %653 = vmatpush.msrb.mxu3 %v1147_v24 }
 0x463   :  { %v327_v46 = vpop.f32.mrf.mxu2  ;;  %v347_v55 = vpop.f32.mrf.mxu3 }
 0x464   :  { %v352_v47 = vrot.slane %v327_v46, 4  ;;  %v353_v56 = vrot.slane %v347_v55, 4 }
 0x466   :  { %v356_v48 = vadd.f32 %v352_v47, %v1236_v29  ;;  %v357_v57 = vadd.f32 %v353_v56, %v1243_v41 }
 0x468   :  { %v358_v50 = vmul.f32 0.5, %v356_v48  ;;  %v359_v58 = vmul.f32 %v357_v57, %v1246_v45 }
 0x46a   :  { %908 = vtanh.f32 %v358_v50  ;;  %v1352_v50 = vadd.f32 %v1280_v15, %v72_v38 }
 0x46b   :  { %910 = vtanh.f32 %v359_v58 }
 0x470   :  { %v909_v51 = vpop.eup %908 }
 0x471   :  { %v362_v52 = vmul.f32 0.5, %v909_v51  ;;  %v911_v59 = vpop.eup %910 }
 0x472   :  { %v363_v61 = vmul.f32 %v911_v59, %v1246_v45 }
 0x473   :  { %v364_v53 = vadd.f32 0.5, %v362_v52 }
 0x474   :  { %v365_v62 = vadd.f32 %v363_v61, %v1250_v49 }
 0x475   :  { %v367_v54 = vrot.slane %v364_v53, 4 }
 0x476   :  { %v372_v63 = vmul.f32 %v365_v62, %v364_v53 }
 0x477   :  { %368 = vrot.lane.b32.xlu0 %v367_v54, %s1032_s8 }
 0x478   :  { %v374_v9 = vrot.slane %v372_v63, 4 }
 0x4e9   :  { %v369_v8 = vpop.permute.xlu0 %368 }
 0x4ea   :  { %v371_v10 = vmul.f32 %v369_v8, %v296_v36 }
 0x4ec   :  { %v376_v11 = vadd.f32 %v374_v9, %v371_v10 }
 0x4ee   :  { %912 = vtanh.f32 %v376_v11 }
 0x4f4   :  { %v913_v14 = vpop.eup %912 }
 0x4f5   :  { %v379_v18 = vrot.slane %v913_v14, 4 }
 0x4f7   :  { %380 = vrot.lane.b32.xlu1 %v379_v18, %s1032_s8 }
 0x569   :  { %v381_v19 = vpop.permute.xlu1 %380 }
 0x56a   :  { %v383_v22 = vmul.f32 %v381_v19, %v365_v62 }
 0x56c   :  { %v385_v25 = vrot.slane %v383_v22, 4 }
 0x56e   :  { %386 = vrot.lane.b32.xlu2 %v385_v25, %s1032_s8 }
 0x5c8   :  { %v387_v28 = vpop.permute.xlu2 %386 }
 0x5c9   :  { %875 = vmatmul.msk.f32.vlgmr.msra.gmra.mxu0 %vm158_vm1, %v387_v28  ;;  %876 = vmatmul.msk.f32.vlgmr.msra.gmra.mxu1 %vm158_vm1, %v387_v28 }
 0x5ca   :  { %706 = vmatpush.msra.mxu0 %v1081_v0  ;;  %726 = vmatpush.msra.mxu1 %v1083_v1 }
 0x5cc   :  { %707 = vmatpush.msra.mxu0 %v1085_v2  ;;  %727 = vmatpush.msra.mxu1 %v1089_v3 }
 0x5ce   :  { %708 = vmatpush.msra.mxu0 %v1091_v4  ;;  %728 = vmatpush.msra.mxu1 %v1093_v5 }
 0x5d0   :  { %709 = vmatpush.msra.mxu0 %v1097_v6  ;;  %729 = vmatpush.msra.mxu1 %v1099_v7 }
 0x5d2   :  { %710 = vmatpush.msra.mxu0 %v1115_v12  ;;  %730 = vmatpush.msra.mxu1 %v1117_v13 }
 0x5d4   :  { %711 = vmatpush.msra.mxu0 %v1127_v16  ;;  %731 = vmatpush.msra.mxu1 %v1129_v17 }
 0x5d6   :  { %712 = vmatpush.msra.mxu0 %v1139_v20  ;;  %732 = vmatpush.msra.mxu1 %v1141_v21 }
 0x5d8   :  { %713 = vmatpush.msra.mxu0 %v1145_v23  ;;  %733 = vmatpush.msra.mxu1 %v1147_v24 }
 0x646   :  { %v407_v0 = vpop.f32.mrf.mxu0  ;;  %v427_v12 = vpop.f32.mrf.mxu1 }
 0x647   :  { %v432_v1 = vrot.slane %v407_v0, 2  ;;  %v433_v13 = vrot.slane %v427_v12, 2 }
 0x649   :  { %v436_v2 = vadd.f32 %v432_v1, %v1236_v29  ;;  %v437_v16 = vadd.f32 %v433_v13, %v1243_v41 }
 0x64b   :  { %v438_v3 = vmul.f32 0.5, %v436_v2  ;;  %v439_v17 = vmul.f32 %v437_v16, %v1246_v45 }
 0x64d   :  { %914 = vtanh.f32 %v438_v3 }
 0x64e   :  { %916 = vtanh.f32 %v439_v17 }
 0x653   :  { %v915_v4 = vpop.eup %914 }
 0x654   :  { %v442_v5 = vmul.f32 0.5, %v915_v4  ;;  %v917_v20 = vpop.eup %916 }
 0x655   :  { %v443_v21 = vmul.f32 %v917_v20, %v1246_v45 }
 0x656   :  { %v444_v6 = vadd.f32 0.5, %v442_v5 }
 0x657   :  { %v445_v23 = vadd.f32 %v443_v21, %v1250_v49 }
 0x658   :  { %v447_v7 = vrot.slane %v444_v6, 6 }
 0x659   :  { %v452_v24 = vmul.f32 %v445_v23, %v444_v6 }
 0x65a   :  { %448 = vrot.lane.b32.xlu0 %v447_v7, %s1032_s8 }
 0x65b   :  { %v454_v30 = vrot.slane %v452_v24, 6 }
 0x6cc   :  { %v449_v29 = vpop.permute.xlu0 %448 }
 0x6cd   :  { %v451_v31 = vmul.f32 %v449_v29, %v376_v11 }
 0x6cf   :  { %v456_v32 = vadd.f32 %v454_v30, %v451_v31 }
 0x6d1   :  { %918 = vtanh.f32 %v456_v32 }
 0x6d7   :  { %v919_v33 = vpop.eup %918 }
 0x6d8   :  { %v459_v34 = vrot.slane %v919_v33, 2 }
 0x6da   :  { %460 = vrot.lane.b32.xlu1 %v459_v34, %s1032_s8 }
 0x74c   :  { %v461_v35 = vpop.permute.xlu1 %460 }
 0x74d   :  { %v463_v41 = vmul.f32 %v461_v35, %v445_v23 }
 0x74f   :  { %v465_v36 = vrot.slane %v463_v41, 6 }
 0x751   :  { %466 = vrot.lane.b32.xlu2 %v465_v36, %s1032_s8 }
 0x7ab   :  { %v467_v37 = vpop.permute.xlu2 %466 }
 0x7ac   :  { %877 = vmatmul.msk.f32.vlgmr.msra.gmra.mxu2 %vm158_vm1, %v467_v37  ;;  %878 = vmatmul.msk.f32.vlgmr.msra.gmra.mxu3 %vm158_vm1, %v467_v37 }
 0x82f   :  { %v487_v40 = vpop.f32.mrf.mxu2  ;;  %v507_v48 = vpop.f32.mrf.mxu3 }
 0x830   :  { %v510_v42 = vadd.f32 %v487_v40, %v1345_v39  ;;  %v511_v51 = vadd.f32 %v507_v48, %v1352_v50 }
 0x832   :  { %v512_v43 = vmul.f32 0.5, %v510_v42  ;;  %v513_v27 = vmul.f32 %v511_v51, %v1246_v45 }
 0x834   :  { %920 = vtanh.f32 %v512_v43 }
 0x835   :  { %922 = vtanh.f32 %v513_v27 }
 0x83a   :  { %v921_v44 = vpop.eup %920 }
 0x83b   :  { %v516_v46 = vmul.f32 0.5, %v921_v44  ;;  %v923_v60 = vpop.eup %922 }
 0x83c   :  { %v517_v52 = vmul.f32 %v923_v60, %v1246_v45 }
 0x83d   :  { %v518_v47 = vadd.f32 0.5, %v516_v46 }
 0x83e   :  { %v519_v53 = vadd.f32 %v517_v52, %v1250_v49 }
 0x83f   :  { %521 = vrot.lane.b32.xlu0 %v518_v47, %s1032_s8 }
 0x840   :  { %v525_v56 = vmul.f32 %v519_v53, %v518_v47 }
 0x8b1   :  { %v522_v54 = vpop.permute.xlu0 %521 }
 0x8b2   :  { %v524_v55 = vmul.f32 %v522_v54, %v456_v32 }
 0x8b4   :  { %v526_v57 = vadd.f32 %v525_v56, %v524_v55 }
 0x8b6   :  { %924 = vtanh.f32 %v526_v57 }
 0x8bc   :  { %v925_v58 = vpop.eup %924 }
 0x8bd   :  { %529 = vrot.lane.b32.xlu1 %v925_v58, %s1032_s8 }
 0x92f   :  { %v530_v26 = vpop.permute.xlu1 %529 }
 0x930   :  { %v532_v38 = vmul.f32 %v530_v26, %v519_v53 }
 0x932   :  { %534 = vrot.lane.b32.xlu2 %v532_v38, %s1032_s8 }
 0x98c   :  { %v535_v15 = vpop.permute.xlu2 %534 }
 0x98d   :  { %879 = vmatmul.msk.f32.vlgmr.msrb.gmra.mxu0 %vm158_vm1, %v535_v15  ;;  %880 = vmatmul.msk.f32.vlgmr.msrb.gmra.mxu1 %vm158_vm1, %v535_v15 }
 0xa0a   :  { %v555_v59 = vpop.f32.mrf.mxu0  ;;  %v575_v14 = vpop.f32.mrf.mxu1 }
 0xa0b   :  { %v580_v61 = vrot.slane %v555_v59, 6  ;;  %v581_v18 = vrot.slane %v575_v14, 6 }
 0xa0d   :  { %v584_v62 = vadd.f32 %v580_v61, %v1345_v39  ;;  %v585_v19 = vadd.f32 %v581_v18, %v1352_v50 }
 0xa0f   :  { %v586_v63 = vmul.f32 0.5, %v584_v62  ;;  %v587_v22 = vmul.f32 %v585_v19, %v1246_v45 }
 0xa11   :  { %926 = vtanh.f32 %v586_v63 }
 0xa12   :  { %928 = vtanh.f32 %v587_v22 }
 0xa17   :  { %v927_v8 = vpop.eup %926 }
 0xa18   :  { %v590_v9 = vmul.f32 0.5, %v927_v8  ;;  %v929_v25 = vpop.eup %928 }
 0xa19   :  { %v591_v28 = vmul.f32 %v929_v25, %v1246_v45 }
 0xa1a   :  { %v592_v10 = vadd.f32 0.5, %v590_v9 }
 0xa1b   :  { %v593_v0 = vadd.f32 %v591_v28, %v1250_v49  ;;  %v776_v28 = vld [vmem:[%s1429_s5 + $0x20] sm:$0xff] }
 0xa1c   :  { %v595_v11 = vrot.slane %v592_v10, 2 }
 0xa1d   :  { %v600_v1 = vmul.f32 %v593_v0, %v592_v10 }
 0xa1e   :  { %596 = vrot.lane.b32.xlu0 %v595_v11, %s1032_s8 }
 0xa1f   :  { %v602_v3 = vrot.slane %v600_v1, 2  ;;  %v774_v1 = vld [vmem:[%s1429_s5 + $0x10] sm:$0xff] }
 0xa90   :  { %v597_v2 = vpop.permute.xlu0 %596 }
 0xa91   :  { %v599_v4 = vmul.f32 %v597_v2, %v526_v57  ;;  %v773_v2 = vld [vmem:[%s1429_s5 + $0x8] sm:$0xff] }
 0xa93   :  { %v604_v5 = vadd.f32 %v602_v3, %v599_v4  ;;  %v772_v3 = vld [vmem:[%s1429_s5] sm:$0xff] }
 0xa95   :  { %930 = vtanh.f32 %v604_v5 }
 0xa9b   :  { %v931_v6 = vpop.eup %930 }
 0xa9c   :  { %v607_v7 = vrot.slane %v931_v6, 6 }
 0xa9e   :  { %608 = vrot.lane.b32.xlu1 %v607_v7, %s1032_s8 }
 0xb10   :  { %v609_v12 = vpop.permute.xlu1 %608 }
 0xb11   :  { %v611_v13 = vmul.f32 %v609_v12, %v593_v0  ;;  %v775_v0 = vld [vmem:[%s1429_s5 + $0x18] sm:$0xff]  ;;  %v895_v12 = vld [vmem:[%s1430_s6] ss:$0 sm:$0xff] }
 0xb13   :  { %v613_v16 = vrot.slane %v611_v13, 2 }
 0xb15   :  { %614 = vrot.lane.b32.xlu2 %v613_v16, %s1032_s8 }
 0xb6f   :  { %v615_v17 = vpop.permute.xlu2 %614 }
 0xb70   :  { %881 = vmatmul.msk.f32.vlgmr.msrb.gmra.mxu2 %vm158_vm1, %v615_v17  ;;  %882 = vmatmul.msk.f32.vlgmr.msrb.gmra.mxu3 %vm158_vm1, %v615_v17 }
 0xbf3   :  { %v635_v20 = vpop.f32.mrf.mxu2  ;;  %v655_v33 = vpop.f32.mrf.mxu3 }
 0xbf4   :  { %v660_v21 = vrot.slane %v635_v20, 4  ;;  %v661_v34 = vrot.slane %v655_v33, 4 }
 0xbf6   :  { %v664_v23 = vadd.f32 %v660_v21, %v1345_v39  ;;  %v665_v35 = vadd.f32 %v661_v34, %v1352_v50 }
 0xbf8   :  { %v666_v24 = vmul.f32 0.5, %v664_v23  ;;  %v667_v41 = vmul.f32 %v665_v35, %v1246_v45 }
 0xbfa   :  { %932 = vtanh.f32 %v666_v24 }
 0xbfb   :  { %934 = vtanh.f32 %v667_v41 }
 0xc00   :  { %v933_v29 = vpop.eup %932 }
 0xc01   :  { %v670_v30 = vmul.f32 0.5, %v933_v29  ;;  %v935_v36 = vpop.eup %934 }
 0xc02   :  { %v671_v37 = vmul.f32 %v935_v36, %v1246_v45 }
 0xc03   :  { %v672_v31 = vadd.f32 0.5, %v670_v30 }
 0xc04   :  { %v673_v40 = vadd.f32 %v671_v37, %v1250_v49 }
 0xc05   :  { %v675_v32 = vrot.slane %v672_v31, 4 }
 0xc06   :  { %v680_v42 = vmul.f32 %v673_v40, %v672_v31 }
 0xc07   :  { %676 = vrot.lane.b32.xlu0 %v675_v32, %s1032_s8 }
 0xc08   :  { %v682_v44 = vrot.slane %v680_v42, 4 }
 0xc79   :  { %v677_v43 = vpop.permute.xlu0 %676 }
 0xc7a   :  { %v679_v46 = vmul.f32 %v677_v43, %v604_v5 }
 0xc7c   :  { %v684_v47 = vadd.f32 %v682_v44, %v679_v46 }
 0xc7e   :  { %936 = vtanh.f32 %v684_v47 }
 0xc84   :  { %v937_v48 = vpop.eup %936 }
 0xc85   :  { %v687_v51 = vrot.slane %v937_v48, 4 }
 0xc87   :  { %688 = vrot.lane.b32.xlu1 %v687_v51, %s1032_s8 }
 0xcf9   :  { %v689_v27 = vpop.permute.xlu1 %688 }
 0xcfa   :  { %v691_v60 = vmul.f32 %v689_v27, %v673_v40 }
 0xcfc   :  { %v693_v52 = vrot.slane %v691_v60, 4 }
 0xcfe   :  { %694 = vrot.lane.b32.xlu2 %v693_v52, %s1032_s8 }
 0xd58   :  { %v695_v53 = vpop.permute.xlu2 %694 }
 0xd59   :  { %883 = vmatmul.msk.f32.vlgmr.msra.gmra.mxu0 %vm158_vm1, %v695_v53  ;;  %884 = vmatmul.msk.f32.vlgmr.msra.gmra.mxu1 %vm158_vm1, %v695_v53 }
 0xdd6   :  { %v715_v54 = vpop.f32.mrf.mxu0  ;;  %v735_v59 = vpop.f32.mrf.mxu1 }
 0xdd7   :  { %v740_v55 = vrot.slane %v715_v54, 2  ;;  %v741_v61 = vrot.slane %v735_v59, 2 }
 0xdd9   :  { %v744_v56 = vadd.f32 %v740_v55, %v1345_v39  ;;  %v745_v62 = vadd.f32 %v741_v61, %v1352_v50  ;;  %v779_v50 = vld [vmem:[%s1429_s5 + $0x38] sm:$0xff] }
 0xdda   :  { %798 = vmatpush.msra.mxu2 %v779_v50 }
 0xddb   :  { %v746_v57 = vmul.f32 0.5, %v744_v56  ;;  %v747_v63 = vmul.f32 %v745_v62, %v1246_v45 }
 0xddd   :  { %938 = vtanh.f32 %v746_v57 }
 0xdde   :  { %940 = vtanh.f32 %v747_v63 }
 0xde3   :  { %v939_v58 = vpop.eup %938 }
 0xde4   :  { %v750_v26 = vmul.f32 0.5, %v939_v58  ;;  %v941_v8 = vpop.eup %940 }
 0xde5   :  { %v751_v9 = vmul.f32 %v941_v8, %v1246_v45  ;;  %v778_v45 = vld [vmem:[%s1429_s5 + $0x30] sm:$0xff] }
 0xde6   :  { %v752_v38 = vadd.f32 0.5, %v750_v26  ;;  %799 = vmatpush.msra.mxu2 %v778_v45 }
 0xde7   :  { %v753_v39 = vadd.f32 %v751_v9, %v1250_v49  ;;  %v777_v49 = vld [vmem:[%s1429_s5 + $0x28] sm:$0xff]  ;;  %s1034_s5 = smov [#allocation7]  }
 0xde8   :  { %v755_v15 = vrot.slane %v752_v38, 6  ;;  %800 = vmatpush.msra.mxu2 %v777_v49  ;;  %s852_s6 = sshll.u32 %s1034_s5, 4  ;;  %s853_s6 = int_to_ptr.vmem [resolvable:$true] %s852_s6 }
 0xde9   :  { %v760_v10 = vmul.f32 %v753_v39, %v752_v38 }
 0xdea   :  { %756 = vrot.lane.b32.xlu0 %v755_v15, %s1032_s8  ;;  %801 = vmatpush.msra.mxu2 %v776_v28 }
 0xdeb   :  { %v762_v14 = vrot.slane %v760_v10, 6 }
 0xdec   :  { %802 = vmatpush.msra.mxu2 %v775_v0 }
 0xdee   :  { %803 = vmatpush.msra.mxu2 %v774_v1 }
 0xdf0   :  { %804 = vmatpush.msra.mxu2 %v773_v2 }
 0xdf2   :  { %805 = vmatpush.msra.mxu2 %v772_v3 }
 0xe5c   :  { %v757_v11 = vpop.permute.xlu0 %756 }
 0xe5d   :  { %v759_v18 = vmul.f32 %v757_v11, %v684_v47 }
 0xe5f   :  { %v764_v19 = vadd.f32 %v762_v14, %v759_v18 }
 0xe61   :  { %942 = vtanh.f32 %v764_v19 }
 0xe67   :  { %v943_v22 = vpop.eup %942 }
 0xe68   :  { %v767_v25 = vrot.slane %v943_v22, 2 }
 0xe6a   :  { %768 = vrot.lane.b32.xlu1 %v767_v25, %s1032_s8 }
 0xedc   :  { %v769_v4 = vpop.permute.xlu1 %768 }
 0xedd   :  { %v771_v5 = vmul.f32 %v769_v4, %v753_v39 }
 0xedf   :  { %v785_v6 = vrot.slane %v771_v5, 6 }
 0xee1   :  { %786 = vrot.lane.b32.xlu2 %v785_v6, %s1032_s8 }
 0xee9   :  { %835 = vrot.lane.b32.xlu2 %v771_v5, %s1032_s8 }
 0xf3b   :  { %v787_v7 = vpop.permute.xlu2 %786 }
 0xf3c   :  { %885 = vmatmul.msk.f32.vlgmr.msra.gmra.mxu2 %vm158_vm1, %v787_v7 }
 0xf43   :  { %v836_v46 = vpop.permute.xlu2 %835 }
 0xfbf   :  { %v807_v13 = vpop.f32.mrf.mxu2 }
 0xfc0   :  { %v808_v16 = vadd.f32 %v895_v12, %v807_v13 }
 0xfc2   :  { %v811_v17 = vsel %vm810_vm3, %v808_v16, -inf }
 0xfc3   :  { %812 = vmax.xlane.f32.xlu0 %v811_v17 }
0x1036   :  { %v813_v20 = vpop.xlane.xlu0 %812 }
0x1037   :  { %v814_v21 = vsub.f32 %v808_v16, %v813_v20 }
0x1039   :  { %v815_v23 = vmul.f32 1.442695, %v814_v21 }
0x103b   :  { %944 = vpow2.f32 %v815_v23 }
0x1041   :  { %v945_v24 = vpop.eup %944 }
0x1042   :  { %v817_v29 = vsel %vm810_vm3, %v945_v24, 0.0 }
0x1043   :  { %818 = vadd.xlane.f32.xlu1 %v817_v29 }
0x10b6   :  { %v819_v30 = vpop.xlane.xlu1 %818 }
0x10b7   :  { %946 = vrcp.f32 %v819_v30  ;;  %v831_v34 = vand.u32 2147483648, %v819_v30  ;;  %v829_v41 = vand.u32 2147483647, %v819_v30  ;;  %vm825_vm5 = vweird.f32 %v819_v30 }
0x10b9   :  { %v832_v37 = vor.u32 1.1754944e-38, %v831_v34  ;;  %vm830_vm7 = vcmp.eq.f32.partialorder %v829_v41, 8.507059e+37 }
0x10bd   :  { %v947_v31 = vpop.eup %946 }
0x10be   :  { %v821_v32 = vmul.f32 %v947_v31, %v819_v30  ;;  %vm826_vm4 = vweird.f32 %v947_v31 }
0x10bf   :  { %vm827_vm6 = vmor %vm825_vm5, %vm826_vm4 }
0x10c0   :  { %v822_v33 = vsub.f32 1.0, %v821_v32 }
0x10c2   :  { %v823_v35 = vmul.f32 %v947_v31, %v822_v33 }
0x10c4   :  { %v824_v36 = vadd.f32 %v947_v31, %v823_v35 }
0x10c6   :  { %v828_v40 = vsel %vm827_vm6, %v947_v31, %v824_v36 }
0x10c7   :  { %v833_v42 = vsel %vm830_vm7, %v832_v37, %v828_v40 }
0x10c8   :  { %v834_v43 = vmul.f32 %v945_v24, %v833_v42 }
0x10ca   :  { %v839_v44 = vrot.slane %v834_v43, 2 }
0x10cc   :  { %840 = vrot.lane.b32.xlu2 %v839_v44, %s1032_s8 }
0x1126   :  { %v841_v47 = vpop.permute.xlu2 %840 }
0x1127   :  { %v843_v48 = vsel %vm158_vm1, %v836_v46, %v841_v47 }
0x1128   :  { %v845_v51 = vsel %vm844_vm8, %v843_v48, 0.0 }
0x1129   :  { %846 = vst [vmem:[#allocation7 - $0x6] sm:$0xc0] %v845_v51 }
0x112a   :  { %857 = dma.vmem_to_hbm [thread:$0]  %s853_s6, 32, %s855_s26, [#allocation4]  }
0x112b   :  { %1024 = dma.done.wait [#allocation4], 32  }
0x112c   :  { %1025 = vsyncadd [#allocation4], 4294967264 }
0x112d   :  { %862 = vsyncpa [#allocation3], 1 }
0x112e   :  { %863 = vsyncpa [#allocation6], 1 }
0x112f   :  { %864 = vsyncpa [#allocation4], 1 }

</bundles_post_ra>
